<compile_context>
chip_gen: v7x
topology: tpu7x:2x2x1
jax: 0.10.0
libtpu: 0.0.40
codegen_flags: <defaults>
</compile_context>

<pallas_src>
import functools

import jax
import jax.numpy as jnp
from jax.experimental import pallas as pl
from jax.experimental.pallas import tpu as pltpu


NCORES = 2  # leading "parallel" grid axis (uses both TCs on v7x; no-op on 1-TC chips)


def _ce2d_kernel(logits_ref, target_ref, sum_ref, cnt_ref, *, ignore_label):
    """One grid step: (1, C, TL) logits tile + (1, 1, TL) target tile.

    Accumulates per-lane nll / valid-count into the resident output blocks
    (one partial row per parallel core); no per-step reduction to scalar."""
    n = pl.program_id(1)
    t = pl.program_id(2)

    @pl.when(jnp.logical_and(n == 0, t == 0))
    def _():
        sum_ref[...] = jnp.zeros_like(sum_ref)
        cnt_ref[...] = jnp.zeros_like(cnt_ref)

    logits = logits_ref[0].astype(jnp.float32)                       # (C, TL)
    tgt = target_ref[0]                                              # (1, TL) int32

    valid = jnp.logical_and(tgt >= 0, tgt != ignore_label)           # (1, TL)

    # Numerically-stable log-softmax pieces, reduced over the class (sublane) axis.
    m = jnp.max(logits, axis=0, keepdims=True)                       # (1, TL)
    shifted = logits - m                                             # (C, TL)
    lse = jnp.log(jnp.sum(jnp.exp(shifted), axis=0, keepdims=True))  # (1, TL)

    # Gather shifted[target] via compare+select (no extra cast/mul); invalid /
    # padded targets (<0 or ignore) match no class and are masked below.
    cls_idx = jax.lax.broadcasted_iota(jnp.int32, shifted.shape, 0)  # (C, TL)
    picked = jnp.sum(jnp.where(cls_idx == tgt, shifted, 0.0),
                     axis=0, keepdims=True)                          # (1, TL)

    nll = jnp.where(valid, lse - picked, 0.0)                        # (1, TL)

    sum_ref[0] += nll
    cnt_ref[0] += valid.astype(jnp.float32)


def _round_up(x, m):
    return ((x + m - 1) // m) * m


def cross_entropy_2d(predict, target, *, ignore_label=1, size_average=True,
                     tile_pixels=8192):
    """predict: (n, c, h, w) float (f32 or bf16); target: (n, h, w) int.
    Returns scalar loss matching CrossEntropy2d.forward (weight=None)."""
    n, c, h, w = predict.shape
    assert target.shape == (n, h, w)

    p = h * w
    logits = predict.reshape(n, c, p)                 # free reshape, stays NCHW
    tgt = target.reshape(n, 1, p).astype(jnp.int32)

    # Lane tile: multiple of 128, large enough to amortize grid overhead, but
    # capped so a double-buffered logits tile stays a few MiB (v7x: 64 MiB VMEM).
    tl = min(_round_up(tile_pixels, 128),
             _round_up(pl.cdiv(p, NCORES), 128))
    vmem_cap = max(128, ((4 * 1024 * 1024) // (c * 4)) // 128 * 128)
    tl = max(128, min(tl, vmem_cap))

    p_pad = _round_up(p, NCORES * tl)
    if p_pad != p:
        # Padded pixels get target=-1 (invalid) and zero logits -> masked in-kernel.
        logits = jnp.pad(logits, ((0, 0), (0, 0), (0, p_pad - p)))
        tgt = jnp.pad(tgt, ((0, 0), (0, 0), (0, p_pad - p)), constant_values=-1)

    t_half = p_pad // (NCORES * tl)                   # pixel tiles per core
    grid = (NCORES, n, t_half)

    kernel = functools.partial(_ce2d_kernel, ignore_label=ignore_label)
    sum_parts, cnt_parts = pl.pallas_call(
        kernel,
        out_shape=(jax.ShapeDtypeStruct((NCORES, 1, tl), jnp.float32),
                   jax.ShapeDtypeStruct((NCORES, 1, tl), jnp.float32)),
        grid_spec=pltpu.PrefetchScalarGridSpec(
            num_scalar_prefetch=0,
            grid=grid,
            in_specs=[
                pl.BlockSpec((1, c, tl), lambda s, i, t: (i, 0, s * t_half + t)),
                pl.BlockSpec((1, 1, tl), lambda s, i, t: (i, 0, s * t_half + t)),
            ],
            out_specs=[
                pl.BlockSpec((1, 1, tl), lambda s, i, t: (s, 0, 0)),
                pl.BlockSpec((1, 1, tl), lambda s, i, t: (s, 0, 0)),
            ],
        ),
        compiler_params=pltpu.CompilerParams(
            dimension_semantics=("parallel", "arbitrary", "arbitrary")),
    )(logits, tgt)

    sum_loss = jnp.sum(sum_parts)
    cnt = jnp.sum(cnt_parts)

    # PyTorch module returns zeros when there are no valid targets.
    # TODO(synk): optional per-class `weight` rescaling is not implemented (weight=None path only).
    if size_average:
        return jnp.where(cnt > 0, sum_loss / jnp.maximum(cnt, 1.0), 0.0)
    else:
        return jnp.where(cnt > 0, sum_loss, 0.0)


def _reference_loss(predict, target, ignore_label=1):
    """Pure-JAX reference of the PyTorch forward (size_average=True, weight=None)."""
    n, c, h, w = predict.shape
    logits = jnp.transpose(predict, (0, 2, 3, 1)).reshape(-1, c).astype(jnp.float32)
    tgt = target.reshape(-1).astype(jnp.int32)
    valid = (tgt >= 0) & (tgt != ignore_label)
    logp = jax.nn.log_softmax(logits, axis=-1)
    picked = jnp.take_along_axis(logp, jnp.clip(tgt, 0, c - 1)[:, None], axis=-1)[:, 0]
    nll = jnp.where(valid, -picked, 0.0)
    cnt = jnp.sum(valid.astype(jnp.float32))
    return jnp.where(cnt > 0, jnp.sum(nll) / jnp.maximum(cnt, 1.0), 0.0)


if __name__ == "__main__":
    key = jax.random.PRNGKey(0)
    k1, k2, k3, k4 = jax.random.split(key, 4)

    n, c, h, w = 2, 4, 16, 16
    predict = jax.random.normal(k1, (n, c, h, w), dtype=jnp.float32)
    # targets in [-1, c) so that some are ignored (label 1 = ignore, -1 = invalid)
    target = jax.random.randint(k2, (n, h, w), minval=-1, maxval=c, dtype=jnp.int32)

    loss = cross_entropy_2d(predict, target, ignore_label=1, size_average=True)
    loss = jax.block_until_ready(loss)
    ref = _reference_loss(predict, target, ignore_label=1)
    assert jnp.allclose(loss, ref, atol=1e-5, rtol=1e-5), (loss, ref)

    # Misaligned spatial size exercises the lane-padding path (P=100 -> pad to 256).
    h2 = w2 = 10
    predict2 = jax.random.normal(k3, (n, c, h2, w2), dtype=jnp.float32)
    target2 = jax.random.randint(k4, (n, h2, w2), minval=-1, maxval=c, dtype=jnp.int32)
    loss2 = jax.block_until_ready(
        cross_entropy_2d(predict2, target2, ignore_label=1, size_average=True))
    ref2 = _reference_loss(predict2, target2, ignore_label=1)
    assert jnp.allclose(loss2, ref2, atol=1e-5, rtol=1e-5), (loss2, ref2)

    print("KERNEL_OK")
</pallas_src>

<mosaic_0001>
module attributes {stable_mosaic.version = 11 : i64} {
  func.func @_ce2d_kernel(%arg0: i32, %arg1: i32, %arg2: i32, %arg3: memref<1x4x128xf32, #tpu.memory_space<vmem>>, %arg4: memref<1x1x128xi32, #tpu.memory_space<vmem>>, %arg5: memref<1x1x128xf32, #tpu.memory_space<vmem>>, %arg6: memref<1x1x128xf32, #tpu.memory_space<vmem>>) attributes {dimension_semantics = [#tpu.dimension_semantics<parallel>, #tpu.dimension_semantics<arbitrary>, #tpu.dimension_semantics<arbitrary>], iteration_bounds = array<i64: 2, 2, 1>, scalar_prefetch = 0 : i64, scratch_operands = 0 : i64, tpu.core_type = #tpu.core_type<tc>, window_params = [{transform_indices = @transform_0, window_bounds = array<i64: 1, 4, 128>}, {transform_indices = @transform_1, window_bounds = array<i64: 1, 1, 128>}, {transform_indices = @transform_2, window_bounds = array<i64: 1, 1, 128>}, {transform_indices = @transform_3, window_bounds = array<i64: 1, 1, 128>}]} {
    %c0_i32 = arith.constant 0 : i32
    %0 = arith.cmpi eq, %arg1, %c0_i32 : i32
    %c0_i32_0 = arith.constant 0 : i32
    %1 = arith.cmpi eq, %arg2, %c0_i32_0 : i32
    %2 = arith.andi %0, %1 : i1
    %3 = arith.extui %2 : i1 to i32
    %c0_i32_1 = arith.constant 0 : i32
    %4 = arith.cmpi ne, %3, %c0_i32_1 : i32
    scf.if %4 {
      %cst_24 = arith.constant 0.000000e+00 : f32
      %46 = vector.broadcast %cst_24 : f32 to vector<1x1x128xf32>
      %c0_25 = arith.constant 0 : index
      %c0_26 = arith.constant 0 : index
      %c0_27 = arith.constant 0 : index
      %47 = vector.load %arg5[%c0_25, %c0_26, %c0_27] : memref<1x1x128xf32, #tpu.memory_space<vmem>>, vector<1x1x128xf32>
      tpu.vector_store %arg5[%c0_25, %c0_26, %c0_27], %46 {strides = array<i32>} : memref<1x1x128xf32, #tpu.memory_space<vmem>>, vector<1x1x128xf32>,
      %cst_28 = arith.constant 0.000000e+00 : f32
      %48 = vector.broadcast %cst_28 : f32 to vector<1x1x128xf32>
      %c0_29 = arith.constant 0 : index
      %c0_30 = arith.constant 0 : index
      %c0_31 = arith.constant 0 : index
      %49 = vector.load %arg6[%c0_29, %c0_30, %c0_31] : memref<1x1x128xf32, #tpu.memory_space<vmem>>, vector<1x1x128xf32>
      tpu.vector_store %arg6[%c0_29, %c0_30, %c0_31], %48 {strides = array<i32>} : memref<1x1x128xf32, #tpu.memory_space<vmem>>, vector<1x1x128xf32>,
    } else {
    }
    %c0 = arith.constant 0 : index
    %c0_2 = arith.constant 0 : index
    %c0_3 = arith.constant 0 : index
    %5 = vector.load %arg3[%c0, %c0_2, %c0_3] : memref<1x4x128xf32, #tpu.memory_space<vmem>>, vector<1x4x128xf32>
    %6 = vector.shape_cast %5 : vector<1x4x128xf32> to vector<4x128xf32>
    %c0_4 = arith.constant 0 : index
    %c0_5 = arith.constant 0 : index
    %c0_6 = arith.constant 0 : index
    %7 = vector.load %arg4[%c0_4, %c0_5, %c0_6] : memref<1x1x128xi32, #tpu.memory_space<vmem>>, vector<1x1x128xi32>
    %8 = vector.shape_cast %7 : vector<1x1x128xi32> to vector<1x128xi32>
    %c0_i32_7 = arith.constant 0 : i32
    %9 = vector.broadcast %c0_i32_7 : i32 to vector<1x128xi32>
    %10 = arith.cmpi sge, %8, %9 : vector<1x128xi32>
    %c1_i32 = arith.constant 1 : i32
    %11 = vector.broadcast %c1_i32 : i32 to vector<1x128xi32>
    %12 = arith.cmpi ne, %8, %11 : vector<1x128xi32>
    %13 = arith.andi %10, %12 : vector<1x128xi1>
    %cst = arith.constant dense<0xFF800000> : vector<128xf32>
    %14 = vector.multi_reduction <maximumf>, %6, %cst [0] : vector<4x128xf32> to vector<128xf32>
    %15 = vector.shape_cast %14 : vector<128xf32> to vector<1x128xf32>
    %16 = vector.broadcast %15 : vector<1x128xf32> to vector<4x128xf32>
    %17 = arith.subf %6, %16 : vector<4x128xf32>
    %18 = math.exp %17 : vector<4x128xf32>
    %cst_8 = arith.constant dense<0.000000e+00> : vector<128xf32>
    %19 = vector.multi_reduction <add>, %18, %cst_8 [0] : vector<4x128xf32> to vector<128xf32>
    %20 = vector.shape_cast %19 : vector<128xf32> to vector<1x128xf32>
    %21 = math.log %20 : vector<1x128xf32>
    %22 = tpu.iota {dimensions = array<i32: 0>} : vector<4x128xi32>
    %23 = vector.broadcast %8 : vector<1x128xi32> to vector<4x128xi32>
    %24 = arith.cmpi eq, %22, %23 : vector<4x128xi32>
    %cst_9 = arith.constant 0.000000e+00 : f32
    %25 = vector.broadcast %cst_9 : f32 to vector<4x128xf32>
    %26 = arith.select %24, %17, %25 : vector<4x128xi1>, vector<4x128xf32>
    %cst_10 = arith.constant dense<0.000000e+00> : vector<128xf32>
    %27 = vector.multi_reduction <add>, %26, %cst_10 [0] : vector<4x128xf32> to vector<128xf32>
    %28 = vector.shape_cast %27 : vector<128xf32> to vector<1x128xf32>
    %29 = arith.subf %21, %28 : vector<1x128xf32>
    %cst_11 = arith.constant 0.000000e+00 : f32
    %30 = vector.broadcast %cst_11 : f32 to vector<1x128xf32>
    %31 = arith.select %13, %29, %30 : vector<1x128xi1>, vector<1x128xf32>
    %c0_12 = arith.constant 0 : index
    %c0_13 = arith.constant 0 : index
    %c0_14 = arith.constant 0 : index
    %32 = vector.load %arg5[%c0_12, %c0_13, %c0_14] : memref<1x1x128xf32, #tpu.memory_space<vmem>>, vector<1x1x128xf32>
    %33 = vector.shape_cast %32 : vector<1x1x128xf32> to vector<1x128xf32>
    %34 = arith.addf %33, %31 : vector<1x128xf32>
    %c0_15 = arith.constant 0 : index
    %c0_16 = arith.constant 0 : index
    %c0_17 = arith.constant 0 : index
    %35 = vector.load %arg5[%c0_15, %c0_16, %c0_17] : memref<1x1x128xf32, #tpu.memory_space<vmem>>, vector<1x1x128xf32>
    %36 = vector.shape_cast %35 : vector<1x1x128xf32> to vector<1x128xf32>
    %37 = vector.shape_cast %34 : vector<1x128xf32> to vector<1x1x128xf32>
    tpu.vector_store %arg5[%c0_15, %c0_16, %c0_17], %37 {strides = array<i32>} : memref<1x1x128xf32, #tpu.memory_space<vmem>>, vector<1x1x128xf32>,
    %c0_18 = arith.constant 0 : index
    %c0_19 = arith.constant 0 : index
    %c0_20 = arith.constant 0 : index
    %38 = vector.load %arg6[%c0_18, %c0_19, %c0_20] : memref<1x1x128xf32, #tpu.memory_space<vmem>>, vector<1x1x128xf32>
    %39 = vector.shape_cast %38 : vector<1x1x128xf32> to vector<1x128xf32>
    %40 = arith.extui %13 : vector<1x128xi1> to vector<1x128xi32>
    %41 = arith.sitofp %40 : vector<1x128xi32> to vector<1x128xf32>
    %42 = arith.addf %39, %41 : vector<1x128xf32>
    %c0_21 = arith.constant 0 : index
    %c0_22 = arith.constant 0 : index
    %c0_23 = arith.constant 0 : index
    %43 = vector.load %arg6[%c0_21, %c0_22, %c0_23] : memref<1x1x128xf32, #tpu.memory_space<vmem>>, vector<1x1x128xf32>
    %44 = vector.shape_cast %43 : vector<1x1x128xf32> to vector<1x128xf32>
    %45 = vector.shape_cast %42 : vector<1x128xf32> to vector<1x1x128xf32>
    tpu.vector_store %arg6[%c0_21, %c0_22, %c0_23], %45 {strides = array<i32>} : memref<1x1x128xf32, #tpu.memory_space<vmem>>, vector<1x1x128xf32>,
    return
  }
  func.func @transform_0(%arg0: i32, %arg1: i32, %arg2: i32) -> (i32, i32, i32) {
    %c1_i32 = arith.constant 1 : i32
    %0 = arith.muli %arg0, %c1_i32 : i32
    %1 = arith.addi %0, %arg2 : i32
    %c0_i32 = arith.constant 0 : i32
    %c0_i32_0 = arith.constant 0 : i32
    return %arg1, %c0_i32, %1 : i32, i32, i32
  }
  func.func @transform_1(%arg0: i32, %arg1: i32, %arg2: i32) -> (i32, i32, i32) {
    %c1_i32 = arith.constant 1 : i32
    %0 = arith.muli %arg0, %c1_i32 : i32
    %1 = arith.addi %0, %arg2 : i32
    %c0_i32 = arith.constant 0 : i32
    %c0_i32_0 = arith.constant 0 : i32
    return %arg1, %c0_i32, %1 : i32, i32, i32
  }
  func.func @transform_2(%arg0: i32, %arg1: i32, %arg2: i32) -> (i32, i32, i32) {
    %c0_i32 = arith.constant 0 : i32
    %c0_i32_0 = arith.constant 0 : i32
    %c0_i32_1 = arith.constant 0 : i32
    return %arg0, %c0_i32, %c0_i32_0 : i32, i32, i32
  }
  func.func @transform_3(%arg0: i32, %arg1: i32, %arg2: i32) -> (i32, i32, i32) {
    %c0_i32 = arith.constant 0 : i32
    %c0_i32_0 = arith.constant 0 : i32
    %c0_i32_1 = arith.constant 0 : i32
    return %arg0, %c0_i32, %c0_i32_0 : i32, i32, i32
  }
}

</mosaic_0001>

<bundles_post_ra>
// kernel: tpu_custom_call.1
= control target key start
LH: loop header
LB: loop body
LE: loop exit
PB: predicated region body
PF: predicated region fallthrough
CT: control target
= control target key end

     0   :  { %s1180_s0 = inlined_call_operand.hbm [shape: f32[2,4,256], index: 0, kind: input, shape index: {}]   ;;  %s1181_s1 = inlined_call_operand.hbm [shape: s32[2,1,256], index: 1, kind: input, shape index: {}]   ;;  %s1182_s2 = inlined_call_operand.hbm [shape: f32[2,1,128], index: 2, kind: output, shape index: {0}]   ;;  %s1183_s3 = inlined_call_operand.hbm [shape: f32[2,1,128], index: 3, kind: output, shape index: {1}]  }
   0x1   :  { %1189 = sst [smem:[#allocation17_spill]] %s1180_s0 }
   0x2   :  { %9 = vsyncpa [#allocation3], 0 }
   0x3   :  { %11 = vsyncpa [#allocation3 + $0x1], 0 }
   0x4   :  { %12 = vsyncpa [#allocation6], 0 }
   0x5   :  { %14 = vsyncpa [#allocation6 + $0x1], 0 }
   0x6   :  { %15 = vsyncpa [#allocation4], 0 }
   0x7   :  { %17 = vsyncpa [#allocation4 + $0x1], 0 }
   0x8   :  { %18 = vsyncpa [#allocation9], 0 }
   0x9   :  { %20 = vsyncpa [#allocation9 + $0x1], 0  ;;  %s868_s12 = smov 0   ;;  %s870_s13 = smov 0  }
   0xa   :  { %s872_s14 = smov 0   ;;  %s874_s15 = smov 0  }
   0xb   :  { %s876_s16 = smov 0   ;;  %s878_s17 = smov 0  }
   0xc   :  { %s880_s18 = smov 0   ;;  %s882_s19 = smov 0  }
   0xd   :  { %s884_s20 = smov 0   ;;  %s886_s21 = smov 0  }
   0xe   :  { %s888_s22 = smov 0  }
   0xf LB: > { %1190 = sst [smem:[#allocation14_spill]] %s836_s21  ;;  %s486_s23 = sadd.s32 4294967295, %s840_s22   ;;  %s840_s22 = sphi %s888_s22, %s26_s22   ;;  %s836_s21 = sphi %s886_s21, %s1210_s21   ;;  %s832_s20 = sphi %s884_s20, %s1218_s20   ;;  %s828_s19 = sphi %s882_s19, %s1208_s19   ;;  %s824_s18 = sphi %s880_s18, %s1217_s18   ;;  %s820_s17 = sphi %s878_s17, %s1216_s17   ;;  %s816_s16 = sphi %s876_s16, %s1215_s16   ;;  %s812_s15 = sphi %s874_s15, %s1214_s15   ;;  %s808_s14 = sphi %s872_s14, %s1213_s14   ;;  %s804_s13 = sphi %s870_s13, %s1212_s13   ;;  %s800_s12 = sphi %s868_s12, %s1211_s12  }
  0x10   : > { %s487_s24 = sadd.s32 4294967294, %s840_s22   ;;  %s41_s25 = sadd.s32 1, %s832_s20 }
  0x11   : > { %s45_s26 = sadd.s32 1, %s836_s21  ;;  %p43_p0 = scmp.ge.s32.totalorder %s41_s25, 2 }
  0x12   : > { %s56_s27 = sadd.s32 1, %s820_s17  ;;  %p63_p1 = scmp.ne.s32.totalorder %s820_s17, %s816_s16 }
  0x13   : > { %p64_p2 = scmp.eq.s32.totalorder %s840_s22, 0  ;;  %s1220_s25 = smov (%p43_p0, %s41_s25), 0 }
  0x14   : > { %1191 = sst [smem:[#allocation15_spill]] %s1220_s25  ;;  %s1222_s26 = smov (!%p43_p0, %s45_s26), %s836_s21 }
  0x15   : > { %s51_s28 = ssub.s32 %s832_s20, %s1220_s25  ;;  %p934_p3 = por %p64_p2, %p63_p1 }
  0x16   : > { %p47_p4 = scmp.ge.s32.totalorder %s1222_s26, 2  ;;  %p69_p5 = scmp.ne.s32.totalorder %s816_s16, %s812_s15 }
  0x17   : > { %p70_p6 = scmp.eq.s32.totalorder %s486_s23, 0  ;;  %s112_s30 = sadd.s32 1, %s808_s14 }
  0x18   : > { %s1224_s26 = smov (%p47_p4, %s1222_s26), 0  ;;  %p122_p8 = scmp.ne.s32.totalorder %s808_s14, %s804_s13 }
  0x19   : > { %1193 = sst [smem:[#allocation16_spill]] %s1224_s26  ;;  %p942_p7 = por %p70_p6, %p69_p5 }
  0x1a   : > { %s52_s5 = ssub.s32 %s836_s21, %s1224_s26  ;;  %p123_p9 = scmp.eq.s32.totalorder %s486_s23, 3 }
  0x1b   : > { %s1194_s4 = scalar_select %p942_p7, 1, 0 }
  0x1c   : > { %s53_s6 = sor.u32 %s52_s5, %s51_s28  ;;  %p110_p10 = scmp.eq.s32.totalorder %s52_s5, 0 }
  0x1d   : > { %p54_p11 = scmp.eq.s32.totalorder %s53_s6, 0  ;;  %p950_p12 = por %p123_p9, %p122_p8 }
  0x1e   : > { %s955_s8 = scalar_select %p110_p10, %s808_s14, %s112_s30  }
  0x1f   : > { %s1195_s7 = scalar_select %p950_p12, 1, 0 }
  0x20   : > { %s958_s9 = scalar_select %p54_p11, %s820_s17, %s56_s27  }
  0x21   : > { %p128_p13 = scmp.ne.s32.totalorder %s804_s13, %s800_s12  ;;  %p129_p0 = scmp.eq.s32.totalorder %s487_s24, 3 }
  0x22   : > { %p526_p1 = scmp.lt.s32.totalorder %s840_s22, 4  ;;  %s968_s11 = sand.u32 1, %s820_s17  }
  0x23   : > { %p963_p2 = por %p129_p0, %p128_p13  ;;  %s490_s15 = sshll.u32 %s968_s11, 2 }
  0x24   : > { %s491_s23 = sshll.u32 %s832_s20, 1  ;;  %s179_s30 = scalar_lea.vmem [#allocation2], %s490_s15 }
  0x25   : > { %s1196_s10 = scalar_select %p963_p2, 1, 0 }
  0x26   : > { %s973_s28 = sadd.s32 %s836_s21, %s491_s23  ;;  %s189_s27 = sshll.u32 %s179_s30, 4  ;;  %s976_s27 = int_to_ptr.vmem [resolvable:$true] %s189_s27 }
  0x27   : > { %s492_s5 = sshll.u32 %s973_s28, 6  ;;  %s1197_s0 = sld [smem:[#allocation17_spill]] }
  0x28   : > { %p985_p4 = pnand %p526_p1, %p934_p3  ;;  %s176_s15 = scalar_lea.sflag [#allocation3], %s968_s11 }
  0x2a   : > { %p624_p9 = pneg %p985_p4 }
  0x2d   : > { %s981_s26 = scalar_lea.hbm %s1197_s0, %s492_s5  ;;  %s627_s5 = scalar_lea.hbm %s1197_s0, 256 }
  0x2e   : > { %s622_s23 = scalar_lea.hbm %s981_s26, 64  ;;  %p628_p3 = scmp.lt.u32.totalorder %s981_s26, %s1197_s0 }
  0x2f   : > { %p623_p8 = scmp.ne.s32.totalorder %s981_s26, %s622_s23  ;;  %p629_p13 = scmp.lt.u32.totalorder %s627_s5, %s622_s23 }
  0x30   : > { %p631_p1 = scmp.lt.u32.totalorder %s622_s23, %s981_s26 }
  0x31   : > { %p625_p10 = pnand %p624_p9, %p623_p8  ;;  %p630_p0 = por %p629_p13, %p628_p3 }
  0x33   : > { %p626_p11 = pneg %p625_p10  ;;  %p632_p5 = por %p631_p1, %p630_p0 }
  0x35   : > { %p633_p6 = pnand %p632_p5, %p626_p11 }
  0x37   : > { %636 = shalt.err (!%p633_p6)
}
  0x38   : > { %s637_s21 = scalar_lea.vmem %s976_s27, 64  ;;  %s842_s29 = smov [#allocation2]  }
  0x39   : > { %p638_p8 = scmp.ne.s32.totalorder %s976_s27, %s637_s21  ;;  %s642_s30 = sshll.u32 %s842_s29, 4  ;;  %s643_s30 = int_to_ptr.vmem [resolvable:$false] %s642_s30 }
  0x3a   : > { %s644_s24 = scalar_lea.vmem %s643_s30, 128  ;;  %p645_p12 = scmp.lt.s32.totalorder %s976_s27, %s643_s30 }
  0x3b   : > { %p640_p10 = pnand %p638_p8, %p624_p9  ;;  %p646_p3 = scmp.lt.s32.totalorder %s644_s24, %s637_s21 }
  0x3d   : > { %p641_p2 = pneg %p640_p10  ;;  %p647_p13 = por %p646_p3, %p645_p12 }
  0x3f   : > { %p648_p0 = pnand %p647_p13, %p641_p2 }
  0x41   : > { %651 = shalt.err (!%p648_p0)
}
  0x42   : > { %515 = dma.hbm_to_vmem [thread:$0]  (!%p985_p4), %s981_s26, 64, %s976_s27, %s176_s15  }
  0x43   : > { %p1199_p5 = scmp.lt.s32.totalorder %s840_s22, 5  ;;  %p1200_p6 = scmp.ge.s32.totalorder %s840_s22, 1 }
  0x44   : > { %s494_s21 = sshll.u32 %s973_s28, 4  ;;  %s199_s5 = scalar_lea.vmem [#allocation5], %s968_s11 }
  0x45   : > { %p1021_p11 = pnand %p1200_p6, %p1199_p5  ;;  %s209_s6 = sshll.u32 %s199_s5, 4  ;;  %s210_s6 = int_to_ptr.vmem [resolvable:$true] %s209_s6 }
  0x46   : > { %s1030_s24 = scalar_lea.hbm %s1181_s1, %s494_s21  ;;  %s197_s26 = scalar_lea.sflag [#allocation6], %s968_s11 }
  0x47   : > { %s1201_s23 = scalar_select %p1021_p11, 1, 0 }
  0x48   : > { %s652_s27 = scalar_lea.hbm %s1030_s24, 16  ;;  %s657_s5 = scalar_lea.hbm %s1181_s1, 64 }
  0x49   : > { %p653_p12 = scmp.ne.s32.totalorder %s1030_s24, %s652_s27  ;;  %p658_p8 = scmp.lt.u32.totalorder %s1030_s24, %s1181_s1 }
  0x4a   : > { %p659_p10 = scmp.lt.u32.totalorder %s657_s5, %s652_s27  ;;  %p661_p13 = scmp.lt.u32.totalorder %s652_s27, %s1030_s24 }
  0x4b   : > { %p655_p2 = pnand %p653_p12, %p624_p9 }
  0x4c   : > { %p660_p3 = por %p659_p10, %p658_p8 }
  0x4d   : > { %p656_p1 = pneg %p655_p2 }
  0x4e   : > { %p662_p0 = por %p661_p13, %p660_p3 }
  0x50   : > { %p663_p5 = pnand %p662_p0, %p656_p1 }
  0x52   : > { %666 = shalt.err (!%p663_p5)
}
  0x53   : > { %s667_s11 = scalar_lea.vmem %s210_s6, 16  ;;  %s843_s21 = smov [#allocation5]  }
  0x54   : > { %p668_p6 = scmp.ne.s32.totalorder %s210_s6, %s667_s11  ;;  %s672_s30 = sshll.u32 %s843_s21, 4  ;;  %s673_s30 = int_to_ptr.vmem [resolvable:$false] %s672_s30 }
  0x55   : > { %s674_s28 = scalar_lea.vmem %s673_s30, 32  ;;  %p675_p7 = scmp.lt.s32.totalorder %s210_s6, %s673_s30 }
  0x56   : > { %p670_p12 = pnand %p668_p6, %p624_p9  ;;  %p676_p11 = scmp.lt.s32.totalorder %s674_s28, %s667_s11 }
  0x58   : > { %p671_p2 = pneg %p670_p12  ;;  %p677_p8 = por %p676_p11, %p675_p7 }
  0x5a   : > { %p678_p10 = pnand %p677_p8, %p671_p2 }
  0x5c   : > { %681 = shalt.err (!%p678_p10)
}
  0x5d   : > { %518 = dma.hbm_to_vmem [thread:$0]  (!%p985_p4), %s1030_s24, 16, %s210_s6, %s197_s26  }
  0x5e   : > { %p1202_p1 = scmp.ne.s32.totalorder %s1201_s23, 0 }
  0x5f   : > { %s220_s0 = sand.u32 (!%p1202_p1), 1, %s816_s16   ;;  %p1203_p9 = scmp.ne.s32.totalorder (!%p1202_p1), %s1194_s4, 0 }
  0x60   : > { %218 = sbr.rel (%p1202_p1) target bundleno = 206 (0xce), region = 28  ;;  %s496_s27 = sshll.u32 (!%p1202_p1), %s220_s0, 2 }
  0x61   : > { %s221_s15 = scalar_lea.sflag (!%p1202_p1), [#allocation3], %s220_s0  ;;  %s224_s5 = scalar_lea.vmem (!%p1202_p1), [#allocation2], %s496_s27 }
  0x67   : > { %783 = dma.done.wait (%p1203_p9), %s221_s15, 64  }
  0x68   : > { %785 = vsyncadd (%p1203_p9), %s221_s15, 4294967232  ;;  %s230_s29 = scalar_lea.sflag [#allocation6], %s220_s0  ;;  %s232_s11 = scalar_lea.vmem [#allocation5], %s220_s0 }
  0x69   : > { %787 = dma.done.wait (%p1203_p9), %s230_s29, 16  }
  0x6a   : > { %789 = vsyncadd (%p1203_p9), %s230_s29, 4294967280  ;;  %s1064_s25 = sand.u32 1, %s804_s13   ;;  %p264_p7 = scmp.eq.s32.totalorder %s824_s18, 0 }
  0x6b   : > { %s1068_s23 = scalar_lea.vmem [#allocation7], %s1064_s25  ;;  %s261_s6 = scalar_lea.vmem [#allocation8], %s1064_s25  ;;  %v844_v0 = vmov (%p264_p7), 0.0  }
  0x6c   : > { %269 = sbr.rel (!%p264_p7) target bundleno = 115 (0x73), region = 40  ;;  %270 = vst [vmem:[%s1068_s23] sm:$0x1] (%p264_p7), %v844_v0  ;;  %271 = vst [vmem:[%s261_s6] sm:$0x1] (%p264_p7), %v844_v0 }
  0x73 PF: > { %v272_v1 = vld [vmem:[%s224_s5] sm:$0xf]  ;;  %vm277_vm0 = vcmask 1043456   ;;  %s499_s18 = sshll.u32 %s828_s19, 4  ;;  %v845_v7 = vmov 0.0   ;;  %s352_s21 = sshll.u32 %s261_s6, 4  ;;  %v297_v12 = vlaneseq  ;;  %s353_s21 = int_to_ptr.vmem [resolvable:$true] %s352_s21 }
  0x74   : > { %v273_v2 = vld [vmem:[%s232_s11] sm:$0x1]  ;;  %v278_v3 = vsel %vm277_vm0, %v272_v1, -inf  ;;  %s1085_s26 = scalar_lea.hbm %s1183_s3, %s499_s18  ;;  %s327_s30 = scalar_lea.sflag [#allocation9], %s1064_s25 }
  0x75   : > { %vm274_vm1 = vcmp.ge.s32.totalorder %v273_v2, 0  ;;  %vm275_vm2 = vcmp.ne.s32.totalorder %v273_v2, 1  ;;  %v279_v5 = vrot.slane %v278_v3, 4  ;;  %v317_v6 = vld [vmem:[%s261_s6] sm:$0x1]  ;;  %s682_s28 = scalar_lea.vmem %s353_s21, 16 }
  0x76   : > { %vm1073_vm3 = vmand %vm274_vm1, %vm275_vm2  ;;  %p683_p4 = scmp.ne.s32.totalorder %s353_s21, %s682_s28  ;;  %p1206_p11 = scmp.ne.s32.totalorder %s1195_s7, 0 }
  0x77   : > { %v498_v8 = vsel %vm1073_vm3, 1.0, %v845_v7  ;;  %v280_v9 = vmax.f32 %v278_v3, %v279_v5  ;;  %s846_s0 = smov [#allocation8]  }
  0x78   : > { %v320_v10 = vadd.f32 %v498_v8, %v317_v6  ;;  %p684_p3 = pnand %p683_p4, %p1206_p11  ;;  %s686_s27 = sshll.u32 %s846_s0, 4  ;;  %s687_s27 = int_to_ptr.vmem [resolvable:$false] %s686_s27 }
  0x79   : > { %v281_v11 = vrot.slane %v280_v9, 2  ;;  %s688_s15 = scalar_lea.vmem %s687_s27, 32  ;;  %p689_p0 = scmp.lt.s32.totalorder %s353_s21, %s687_s27 }
  0x7a   : > { %321 = vst [vmem:[%s261_s6] sm:$0x1] %v320_v10  ;;  %p685_p13 = pneg %p684_p3  ;;  %p690_p5 = scmp.lt.s32.totalorder %s688_s15, %s682_s28 }
  0x7c   : > { %p691_p6 = por %p690_p5, %p689_p0 }
  0x7e   : > { %p692_p12 = pnand %p691_p6, %p685_p13 }
  0x80   : > { %695 = shalt.err (!%p692_p12)
}
  0x81   : > { %s696_s5 = scalar_lea.hbm %s1085_s26, 16  ;;  %s700_s6 = scalar_lea.hbm %s1183_s3, 32 }
  0x82   : > { %p697_p2 = scmp.ne.s32.totalorder %s1085_s26, %s696_s5  ;;  %p701_p1 = scmp.lt.u32.totalorder %s1085_s26, %s1183_s3 }
  0x83   : > { %p702_p9 = scmp.lt.u32.totalorder %s700_s6, %s696_s5  ;;  %p704_p4 = scmp.lt.u32.totalorder %s696_s5, %s1085_s26 }
  0x84   : > { %p698_p8 = pnand %p697_p2, %p1206_p11 }
  0x85   : > { %p703_p7 = por %p702_p9, %p701_p1 }
  0x86   : > { %p699_p10 = pneg %p698_p8 }
  0x87   : > { %p705_p3 = por %p704_p4, %p703_p7 }
  0x89   : > { %p706_p13 = pnand %p705_p3, %p699_p10 }
  0x8b   : > { %709 = shalt.err (!%p706_p13)
}
  0x8c   : > { %509 = dma.vmem_to_hbm [thread:$0]  (%p1206_p11), %s353_s21, 16, %s1085_s26, %s327_s30   ;;  %v282_v13 = vmax.f32 %v280_v9, %v281_v11  ;;  %v298_v15 = vshrl.u32 %v297_v12, 7  ;;  %v314_v40 = vld [vmem:[%s1068_s23] sm:$0x1] }
  0x8d   : > { %s339_s26 = sshll.u32 %s1068_s23, 4  ;;  %s1116_s28 = scalar_lea.hbm %s1182_s2, %s499_s18  ;;  %s1118_s26 = int_to_ptr.vmem [resolvable:$true] %s339_s26 }
  0x8e   : > { %v283_v14 = vrot.slane %v282_v13, 1  ;;  %v301_v18 = vsub.s32 0, %v298_v15  ;;  %s323_s0 = scalar_lea.sflag [#allocation4], %s1064_s25  ;;  %s710_s27 = scalar_lea.vmem %s1118_s26, 16 }
  0x8f   : > { %p711_p0 = scmp.ne.s32.totalorder %s1118_s26, %s710_s27  ;;  %s847_s15 = smov [#allocation7]  }
  0x90   : > { %v284_v16 = vmax.f32 %v282_v13, %v283_v14  ;;  %v302_v20 = vrot.slane %v273_v2, %v301_v18  ;;  %s714_s5 = sshll.u32 %s847_s15, 4  ;;  %s715_s5 = int_to_ptr.vmem [resolvable:$false] %s714_s5 }
  0x91   : > { %p712_p5 = pnand %p711_p0, %p1206_p11  ;;  %s716_s19 = scalar_lea.vmem %s715_s5, 32 }
  0x92   : > { %v285_v17 = vsub.f32 %v272_v1, %v284_v16  ;;  %vm303_vm4 = vcmp.eq.s32.totalorder %v298_v15, %v302_v20  ;;  %p717_p12 = scmp.lt.s32.totalorder %s1118_s26, %s715_s5  ;;  %p718_p2 = scmp.lt.s32.totalorder %s716_s19, %s710_s27 }
  0x93   : > { %p713_p6 = pneg %p712_p5 }
  0x94   : > { %v286_v19 = vmul.f32 1.442695, %v285_v17  ;;  %v304_v21 = vsel %vm303_vm4, %v285_v17, 0.0  ;;  %p719_p8 = por %p718_p2, %p717_p12 }
  0x95   : > { %v305_v23 = vsel %vm277_vm0, %v304_v21, 0.0 }
  0x96   : > { %618 = vpow2.f32 %v286_v19  ;;  %v306_v26 = vrot.slane %v305_v23, 4  ;;  %p720_p10 = pnand %p719_p8, %p713_p6 }
  0x98   : > { %v307_v29 = vadd.f32 %v306_v26, %v305_v23 }
  0x9a   : > { %v308_v32 = vrot.slane %v307_v29, 2 }
  0x9c   : > { %v309_v34 = vadd.f32 %v308_v32, %v307_v29 }
  0x9e   : > { %v310_v35 = vrot.slane %v309_v34, 1 }
  0xa0   : > { %v619_v22 = vpop.eup %618  ;;  %v311_v36 = vadd.f32 %v310_v35, %v309_v34 }
  0xa1   : > { %v288_v24 = vsel %vm277_vm0, %v619_v22, 0.0 }
  0xa2   : > { %v289_v25 = vrot.slane %v288_v24, 4 }
  0xa4   : > { %v290_v27 = vadd.f32 %v289_v25, %v288_v24 }
  0xa6   : > { %v291_v28 = vrot.slane %v290_v27, 2 }
  0xa8   : > { %v292_v30 = vadd.f32 %v291_v28, %v290_v27 }
  0xaa   : > { %v293_v31 = vrot.slane %v292_v30, 1 }
  0xac   : > { %v294_v33 = vadd.f32 %v293_v31, %v292_v30 }
  0xae   : > { %620 = vlog2.f32 %v294_v33 }
  0xb8   : > { %v621_v37 = vpop.eup %620 }
  0xb9   : > { %v296_v38 = vmul.f32 0.6931472, %v621_v37 }
  0xbb   : > { %v312_v39 = vsub.f32 %v296_v38, %v311_v36 }
  0xbd   : > { %v313_v41 = vsel %vm1073_vm3, %v312_v39, 0.0 }
  0xbe   : > { %v315_v42 = vadd.f32 %v314_v40, %v313_v41 }
  0xc0   : > { %316 = vst [vmem:[%s1068_s23] sm:$0x1] %v315_v42 }
  0xc1   : > { %723 = shalt.err (!%p720_p10)
}
  0xc2   : > { %s724_s25 = scalar_lea.hbm %s1116_s28, 16  ;;  %s728_s29 = scalar_lea.hbm %s1182_s2, 32 }
  0xc3   : > { %p725_p1 = scmp.ne.s32.totalorder %s1116_s28, %s724_s25  ;;  %p729_p4 = scmp.lt.u32.totalorder %s1116_s28, %s1182_s2 }
  0xc4   : > { %p730_p3 = scmp.lt.u32.totalorder %s728_s29, %s724_s25  ;;  %p732_p0 = scmp.lt.u32.totalorder %s724_s25, %s1116_s28 }
  0xc5   : > { %p726_p9 = pnand %p725_p1, %p1206_p11 }
  0xc6   : > { %p731_p13 = por %p730_p3, %p729_p4 }
  0xc7   : > { %p727_p7 = pneg %p726_p9 }
  0xc8   : > { %p733_p5 = por %p732_p0, %p731_p13 }
  0xca   : > { %p734_p6 = pnand %p733_p5, %p727_p7 }
  0xcc   : > { %737 = shalt.err (!%p734_p6)
}
  0xcd   : > { %508 = dma.vmem_to_hbm [thread:$0]  (%p1206_p11), %s1118_s26, 16, %s1116_s28, %s323_s0  }
  0xce PF: > { %p527_p12 = scmp.ge.s32.totalorder %s840_s22, 2  ;;  %s364_s4 = sand.u32 1, %s800_s12  }
  0xcf   : > { %p1207_p2 = scmp.ne.s32.totalorder %s1196_s10, 0  ;;  %s365_s24 = scalar_lea.sflag [#allocation4], %s364_s4 }
  0xd1   : > { %p520_p8 = pnand %p527_p12, %p1207_p2 }
  0xd3   : > { %791 = dma.done.wait (!%p520_p8), %s365_s24, 16  }
  0xd4   : > { %793 = vsyncadd (!%p520_p8), %s365_s24, 4294967280  ;;  %s373_s21 = scalar_lea.sflag [#allocation9], %s364_s4 }
  0xd5   : > { %795 = dma.done.wait (!%p520_p8), %s373_s21, 16  }
  0xd6   : > { %797 = vsyncadd (!%p520_p8), %s373_s21, 4294967280  ;;  %s26_s22 = sadd.s32 1, %s840_s22   ;;  %s1208_s19 = sld [smem:[#allocation14_spill]] }
  0xd7   : > { %p23_p10 = scmp.ge.s32.totalorder %s26_s22, 6   ;;  %s1209_s7 = sld [smem:[#allocation15_spill]] }
  0xd8   : > { %s1210_s21 = sld [smem:[#allocation16_spill]]  ;;  %s1211_s12 = smov %s804_s13 }
  0xd9   : > { %s1212_s13 = smov %s808_s14  ;;  %s1213_s14 = smov %s955_s8 }
  0xda   : > { %s1214_s15 = smov %s816_s16  ;;  %s1215_s16 = smov %s820_s17 }
  0xdb   : > { %s1216_s17 = smov %s958_s9  ;;  %s1217_s18 = smov %s832_s20 }
  0xdc   :  { %25 = sbr.rel (!%p23_p10) target bundleno = 15 (0xf), region = 107 }
  0xdd   : > { %s1218_s20 = smov %s1209_s7 }
  0xe3   :  { %377 = vsyncpa [#allocation3], 1 }
  0xe4   :  { %379 = vsyncpa [#allocation3 + $0x1], 1 }
  0xe5   :  { %380 = vsyncpa [#allocation6], 1 }
  0xe6   :  { %382 = vsyncpa [#allocation6 + $0x1], 1 }
  0xe7   :  { %383 = vsyncpa [#allocation4], 1 }
  0xe8   :  { %385 = vsyncpa [#allocation4 + $0x1], 1 }
  0xe9   :  { %386 = vsyncpa [#allocation9], 1 }
  0xea   :  { %388 = vsyncpa [#allocation9 + $0x1], 1 }

</bundles_post_ra>
